<compile_context>
chip_gen: v7x
topology: tpu7x:2x2x1
jax: 0.10.0
libtpu: 0.0.40
codegen_flags: <defaults>
</compile_context>

<pallas_src>
import functools

import jax
import jax.numpy as jnp
from jax.experimental import pallas as pl
from jax.experimental.pallas import tpu as pltpu


# ----------------------------------------------------------------------------
# In-kernel 'same' stride-1 conv on a flattened (C, H*W) tile:
# accumulate kh*kw shifted sub-matmuls (shift along the lane axis), masking
# lanes whose source column wrapped across a row boundary.  Height-boundary
# padding is handled automatically by the zero padding at the array ends.
# ----------------------------------------------------------------------------
def _conv_same_accum(x_flat, w_taps, bias, kh, kw, pad, H, W, ow_iota):
    """x_flat: (Cin, H*W), w_taps: (kh*kw, Cout, Cin) [tap t = di*kw + dj],
    bias: (Cout, 1), ow_iota: (1, H*W) int32 column index.  -> (Cout, H*W) f32."""
    HW = H * W
    P = pad * (W + 1)  # max |flattened shift|
    if P > 0:
        zpad = jnp.zeros((x_flat.shape[0], P), dtype=x_flat.dtype)
        xpad = jnp.concatenate([zpad, x_flat, zpad], axis=1)  # (Cin, HW + 2P)
    else:
        xpad = x_flat

    cout = w_taps.shape[1]
    acc = jnp.zeros((cout, HW), jnp.float32)
    for di in range(kh):
        for dj in range(kw):
            start = di * W + dj          # == P + (di - pad)*W + (dj - pad)
            shifted = xpad[:, start:start + HW]
            # mask lanes whose source column ow + dj - pad falls outside [0, W)
            if dj < pad:
                shifted = jnp.where(ow_iota >= (pad - dj), shifted, 0.0)
            elif dj > pad:
                shifted = jnp.where(ow_iota < (W + pad - dj), shifted, 0.0)
            acc += jnp.dot(w_taps[di * kw + dj], shifted,
                           preferred_element_type=jnp.float32)
    return acc + bias.astype(jnp.float32)


# ----------------------------------------------------------------------------
# Fused kernel: conv_block (+ LeakyReLU) and optional auxiliary_head.
# One grid step == one image; intermediate activation never leaves the chip.
# ----------------------------------------------------------------------------
def _aux_decoder_kernel(*refs, H, W, k1, pad1, has_pred):
    if has_pred:
        x_ref, w1_ref, b1_ref, w2_ref, b2_ref, feat_ref, pred_ref = refs
    else:
        x_ref, w1_ref, b1_ref, feat_ref = refs

    HW = H * W
    ow = jax.lax.broadcasted_iota(jnp.int32, (1, HW), 1) % W

    x = x_ref[0]                                             # (Cin, HW)
    h = _conv_same_accum(x, w1_ref[...], b1_ref[...], k1, k1, pad1, H, W, ow)
    h = jnp.where(h >= 0.0, h, 0.2 * h)                      # LeakyReLU(0.2)
    feat_ref[0] = h.astype(feat_ref.dtype)

    if has_pred:
        p = _conv_same_accum(h, w2_ref[...], b2_ref[...], 3, 3, 1, H, W, ow)
        pred_ref[0] = p.astype(pred_ref.dtype)


# ----------------------------------------------------------------------------
# Forward wrapper (host side does reshapes only).
# ----------------------------------------------------------------------------
def auxiliary_decoder_forward(x, params, kernel_size, stride, padding,
                              is_pred=True):
    assert stride == 1 and 2 * padding == kernel_size - 1, (
        "only stride-1 'same' convs implemented")
    N, Cin, H, W = x.shape
    HW = H * W
    Cout = params["conv_w"].shape[0]

    x_flat = x.reshape(N, Cin, HW)
    w1 = params["conv_w"].transpose(2, 3, 0, 1).reshape(
        kernel_size * kernel_size, Cout, Cin)
    b1 = params["conv_b"].reshape(Cout, 1)

    in_arrays = [x_flat, w1, b1]
    in_specs = [
        pl.BlockSpec((1, Cin, HW), lambda b: (b, 0, 0)),
        pl.BlockSpec(w1.shape, lambda b: (0, 0, 0)),
        pl.BlockSpec(b1.shape, lambda b: (0, 0)),
    ]
    out_shapes = [jax.ShapeDtypeStruct((N, Cout, HW), x.dtype)]
    out_specs = [pl.BlockSpec((1, Cout, HW), lambda b: (b, 0, 0))]

    if is_pred:
        Cpred = params["aux_w"].shape[0]
        w2 = params["aux_w"].transpose(2, 3, 0, 1).reshape(9, Cpred, Cout)
        b2 = params["aux_b"].reshape(Cpred, 1)
        in_arrays += [w2, b2]
        in_specs += [pl.BlockSpec(w2.shape, lambda b: (0, 0, 0)),
                     pl.BlockSpec(b2.shape, lambda b: (0, 0))]
        out_shapes.append(jax.ShapeDtypeStruct((N, Cpred, HW), x.dtype))
        out_specs.append(pl.BlockSpec((1, Cpred, HW), lambda b: (b, 0, 0)))

    kernel = functools.partial(_aux_decoder_kernel, H=H, W=W,
                               k1=kernel_size, pad1=padding, has_pred=is_pred)

    outs = pl.pallas_call(
        kernel,
        out_shape=tuple(out_shapes),
        grid_spec=pltpu.PrefetchScalarGridSpec(
            num_scalar_prefetch=0,
            grid=(N,),
            in_specs=in_specs,
            out_specs=tuple(out_specs),
        ),
        compiler_params=pltpu.CompilerParams(
            dimension_semantics=("parallel",)),
    )(*in_arrays)

    if not isinstance(outs, (tuple, list)):
        outs = (outs,)
    feat = outs[0].reshape(N, Cout, H, W)
    pred = outs[1].reshape(N, -1, H, W) if is_pred else None
    return feat, pred


# ----------------------------------------------------------------------------
# Plain-XLA reference (for correctness check only).
# ----------------------------------------------------------------------------
def _conv2d_ref(x, w, b, stride, padding):
    out = jax.lax.conv_general_dilated(
        x, w, (stride, stride), [(padding, padding), (padding, padding)],
        dimension_numbers=("NCHW", "OIHW", "NCHW"))
    return out + b.reshape(1, -1, 1, 1)


if __name__ == "__main__":
    in_channel, out_channel = 4, 8
    kernel_size, stride, padding = 3, 1, 1
    pred_auxiliary_channel = 2
    is_pred = True

    key = jax.random.PRNGKey(0)
    kx, k0, k1, k2, k3 = jax.random.split(key, 5)
    x = jax.random.normal(kx, (2, in_channel, 16, 16), jnp.float32)  # NCHW
    params = {
        "conv_w": 0.1 * jax.random.normal(
            k0, (out_channel, in_channel, kernel_size, kernel_size), jnp.float32),
        "conv_b": 0.1 * jax.random.normal(k1, (out_channel,), jnp.float32),
        "aux_w": 0.1 * jax.random.normal(
            k2, (pred_auxiliary_channel, out_channel, 3, 3), jnp.float32),
        "aux_b": 0.1 * jax.random.normal(k3, (pred_auxiliary_channel,), jnp.float32),
    }

    feat, pred = auxiliary_decoder_forward(
        x, params, kernel_size, stride, padding, is_pred)
    feat = jax.block_until_ready(feat)
    pred = jax.block_until_ready(pred)

    assert feat.shape == (2, out_channel, 16, 16), feat.shape
    assert pred.shape == (2, pred_auxiliary_channel, 16, 16), pred.shape

    # Correctness vs. XLA conv reference.
    ref_feat = _conv2d_ref(x, params["conv_w"], params["conv_b"], stride, padding)
    ref_feat = jnp.where(ref_feat >= 0.0, ref_feat, 0.2 * ref_feat)
    ref_pred = _conv2d_ref(ref_feat, params["aux_w"], params["aux_b"], 1, 1)
    assert jnp.allclose(feat, ref_feat, atol=1e-3, rtol=1e-3)
    assert jnp.allclose(pred, ref_pred, atol=1e-3, rtol=1e-3)

    print("KERNEL_OK")
</pallas_src>

<mosaic_0001>
module attributes {stable_mosaic.version = 11 : i64} {
  func.func @_aux_decoder_kernel(%arg0: i32, %arg1: memref<1x4x256xf32, #tpu.memory_space<vmem>>, %arg2: memref<9x8x4xf32, #tpu.memory_space<vmem>>, %arg3: memref<8x1xf32, #tpu.memory_space<vmem>>, %arg4: memref<9x2x8xf32, #tpu.memory_space<vmem>>, %arg5: memref<2x1xf32, #tpu.memory_space<vmem>>, %arg6: memref<1x8x256xf32, #tpu.memory_space<vmem>>, %arg7: memref<1x2x256xf32, #tpu.memory_space<vmem>>) attributes {dimension_semantics = [#tpu.dimension_semantics<parallel>], iteration_bounds = array<i64: 2>, scalar_prefetch = 0 : i64, scratch_operands = 0 : i64, tpu.core_type = #tpu.core_type<tc>, window_params = [{transform_indices = @transform_0, window_bounds = array<i64: 1, 4, 256>}, {pipeline_mode = #tpu.pipeline_mode<synchronous>, transform_indices = @transform_1, window_bounds = array<i64: 9, 8, 4>}, {pipeline_mode = #tpu.pipeline_mode<synchronous>, transform_indices = @transform_2, window_bounds = array<i64: 8, 1>}, {pipeline_mode = #tpu.pipeline_mode<synchronous>, transform_indices = @transform_3, window_bounds = array<i64: 9, 2, 8>}, {pipeline_mode = #tpu.pipeline_mode<synchronous>, transform_indices = @transform_4, window_bounds = array<i64: 2, 1>}, {transform_indices = @transform_5, window_bounds = array<i64: 1, 8, 256>}, {transform_indices = @transform_6, window_bounds = array<i64: 1, 2, 256>}]} {
    %0 = tpu.iota {dimensions = array<i32: 1>} : vector<1x256xi32>
    %c16_i32 = arith.constant 16 : i32
    %c0_i32 = arith.constant 0 : i32
    %1 = arith.cmpi eq, %c16_i32, %c0_i32 : i32
    %c1_i32 = arith.constant 1 : i32
    %2 = arith.select %1, %c1_i32, %c16_i32 : i32
    %3 = vector.broadcast %2 : i32 to vector<1x256xi32>
    %4 = arith.remsi %0, %3 : vector<1x256xi32>
    %c0_i32_0 = arith.constant 0 : i32
    %5 = vector.broadcast %c0_i32_0 : i32 to vector<1x256xi32>
    %6 = arith.cmpi ne, %4, %5 : vector<1x256xi32>
    %c0_i32_1 = arith.constant 0 : i32
    %7 = vector.broadcast %c0_i32_1 : i32 to vector<1x256xi32>
    %8 = arith.cmpi slt, %4, %7 : vector<1x256xi32>
    %c0_i32_2 = arith.constant 0 : i32
    %9 = arith.cmpi slt, %2, %c0_i32_2 : i32
    %10 = vector.broadcast %9 : i1 to vector<1x256xi1>
    %11 = vector.broadcast %10 : vector<1x256xi1> to vector<1x256xi1>
    %12 = arith.xori %8, %11 : vector<1x256xi1>
    %13 = arith.andi %12, %6 : vector<1x256xi1>
    %14 = vector.broadcast %2 : i32 to vector<1x256xi32>
    %15 = arith.addi %4, %14 : vector<1x256xi32>
    %16 = arith.select %13, %15, %4 : vector<1x256xi1>, vector<1x256xi32>
    %c0 = arith.constant 0 : index
    %c0_3 = arith.constant 0 : index
    %c0_4 = arith.constant 0 : index
    %17 = vector.load %arg1[%c0, %c0_3, %c0_4] : memref<1x4x256xf32, #tpu.memory_space<vmem>>, vector<1x4x256xf32>
    %18 = vector.shape_cast %17 : vector<1x4x256xf32> to vector<4x256xf32>
    %c0_5 = arith.constant 0 : index
    %c0_6 = arith.constant 0 : index
    %c0_7 = arith.constant 0 : index
    %19 = vector.load %arg2[%c0_5, %c0_6, %c0_7] : memref<9x8x4xf32, #tpu.memory_space<vmem>>, vector<9x8x4xf32>
    %c0_8 = arith.constant 0 : index
    %c0_9 = arith.constant 0 : index
    %20 = vector.load %arg3[%c0_8, %c0_9] : memref<8x1xf32, #tpu.memory_space<vmem>>, vector<8x1xf32>
    %cst = arith.constant 0.000000e+00 : f32
    %21 = vector.broadcast %cst : f32 to vector<4x17xf32>
    %22 = tpu.concatenate %21, %18, %21 in 1 : vector<4x17xf32>, vector<4x256xf32>, vector<4x17xf32> -> vector<4x290xf32>
    %cst_10 = arith.constant 0.000000e+00 : f32
    %23 = vector.broadcast %cst_10 : f32 to vector<8x256xf32>
    %24 = vector.extract_strided_slice %22 {offsets = [0, 0], sizes = [4, 256], strides = [1, 1]} : vector<4x290xf32> to vector<4x256xf32>
    %c1_i32_11 = arith.constant 1 : i32
    %25 = vector.broadcast %c1_i32_11 : i32 to vector<1x256xi32>
    %26 = arith.cmpi sge, %16, %25 : vector<1x256xi32>
    %cst_12 = arith.constant 0.000000e+00 : f32
    %27 = vector.shape_cast %26 : vector<1x256xi1> to vector<1x256xi1>
    %28 = vector.broadcast %27 : vector<1x256xi1> to vector<4x256xi1>
    %29 = vector.broadcast %cst_12 : f32 to vector<4x256xf32>
    %30 = arith.select %28, %24, %29 : vector<4x256xi1>, vector<4x256xf32>
    %31 = vector.extract_strided_slice %19 {offsets = [0, 0, 0], sizes = [1, 8, 4], strides = [1, 1, 1]} : vector<9x8x4xf32> to vector<1x8x4xf32>
    %32 = vector.shape_cast %31 : vector<1x8x4xf32> to vector<8x4xf32>
    %cst_13 = arith.constant dense<0.000000e+00> : vector<8x256xf32>
    %33 = tpu.matmul %32, %30, %cst_13 {dimension_numbers = #tpu.dot_dimension_numbers<[1], [0], [0], [1], [0, 0, 1, 1], [], []>} : vector<8x4xf32>, vector<4x256xf32>, vector<8x256xf32> -> vector<8x256xf32>
    %34 = arith.addf %23, %33 : vector<8x256xf32>
    %35 = vector.extract_strided_slice %22 {offsets = [0, 1], sizes = [4, 256], strides = [1, 1]} : vector<4x290xf32> to vector<4x256xf32>
    %36 = vector.extract_strided_slice %19 {offsets = [1, 0, 0], sizes = [1, 8, 4], strides = [1, 1, 1]} : vector<9x8x4xf32> to vector<1x8x4xf32>
    %37 = vector.shape_cast %36 : vector<1x8x4xf32> to vector<8x4xf32>
    %cst_14 = arith.constant dense<0.000000e+00> : vector<8x256xf32>
    %38 = tpu.matmul %37, %35, %cst_14 {dimension_numbers = #tpu.dot_dimension_numbers<[1], [0], [0], [1], [0, 0, 1, 1], [], []>} : vector<8x4xf32>, vector<4x256xf32>, vector<8x256xf32> -> vector<8x256xf32>
    %39 = arith.addf %34, %38 : vector<8x256xf32>
    %40 = vector.extract_strided_slice %22 {offsets = [0, 2], sizes = [4, 256], strides = [1, 1]} : vector<4x290xf32> to vector<4x256xf32>
    %c15_i32 = arith.constant 15 : i32
    %41 = vector.broadcast %c15_i32 : i32 to vector<1x256xi32>
    %42 = arith.cmpi slt, %16, %41 : vector<1x256xi32>
    %cst_15 = arith.constant 0.000000e+00 : f32
    %43 = vector.shape_cast %42 : vector<1x256xi1> to vector<1x256xi1>
    %44 = vector.broadcast %43 : vector<1x256xi1> to vector<4x256xi1>
    %45 = vector.broadcast %cst_15 : f32 to vector<4x256xf32>
    %46 = arith.select %44, %40, %45 : vector<4x256xi1>, vector<4x256xf32>
    %47 = vector.extract_strided_slice %19 {offsets = [2, 0, 0], sizes = [1, 8, 4], strides = [1, 1, 1]} : vector<9x8x4xf32> to vector<1x8x4xf32>
    %48 = vector.shape_cast %47 : vector<1x8x4xf32> to vector<8x4xf32>
    %cst_16 = arith.constant dense<0.000000e+00> : vector<8x256xf32>
    %49 = tpu.matmul %48, %46, %cst_16 {dimension_numbers = #tpu.dot_dimension_numbers<[1], [0], [0], [1], [0, 0, 1, 1], [], []>} : vector<8x4xf32>, vector<4x256xf32>, vector<8x256xf32> -> vector<8x256xf32>
    %50 = arith.addf %39, %49 : vector<8x256xf32>
    %51 = vector.extract_strided_slice %22 {offsets = [0, 16], sizes = [4, 256], strides = [1, 1]} : vector<4x290xf32> to vector<4x256xf32>
    %c1_i32_17 = arith.constant 1 : i32
    %52 = vector.broadcast %c1_i32_17 : i32 to vector<1x256xi32>
    %53 = arith.cmpi sge, %16, %52 : vector<1x256xi32>
    %cst_18 = arith.constant 0.000000e+00 : f32
    %54 = vector.shape_cast %53 : vector<1x256xi1> to vector<1x256xi1>
    %55 = vector.broadcast %54 : vector<1x256xi1> to vector<4x256xi1>
    %56 = vector.broadcast %cst_18 : f32 to vector<4x256xf32>
    %57 = arith.select %55, %51, %56 : vector<4x256xi1>, vector<4x256xf32>
    %58 = vector.extract_strided_slice %19 {offsets = [3, 0, 0], sizes = [1, 8, 4], strides = [1, 1, 1]} : vector<9x8x4xf32> to vector<1x8x4xf32>
    %59 = vector.shape_cast %58 : vector<1x8x4xf32> to vector<8x4xf32>
    %cst_19 = arith.constant dense<0.000000e+00> : vector<8x256xf32>
    %60 = tpu.matmul %59, %57, %cst_19 {dimension_numbers = #tpu.dot_dimension_numbers<[1], [0], [0], [1], [0, 0, 1, 1], [], []>} : vector<8x4xf32>, vector<4x256xf32>, vector<8x256xf32> -> vector<8x256xf32>
    %61 = arith.addf %50, %60 : vector<8x256xf32>
    %62 = vector.extract_strided_slice %22 {offsets = [0, 17], sizes = [4, 256], strides = [1, 1]} : vector<4x290xf32> to vector<4x256xf32>
    %63 = vector.extract_strided_slice %19 {offsets = [4, 0, 0], sizes = [1, 8, 4], strides = [1, 1, 1]} : vector<9x8x4xf32> to vector<1x8x4xf32>
    %64 = vector.shape_cast %63 : vector<1x8x4xf32> to vector<8x4xf32>
    %cst_20 = arith.constant dense<0.000000e+00> : vector<8x256xf32>
    %65 = tpu.matmul %64, %62, %cst_20 {dimension_numbers = #tpu.dot_dimension_numbers<[1], [0], [0], [1], [0, 0, 1, 1], [], []>} : vector<8x4xf32>, vector<4x256xf32>, vector<8x256xf32> -> vector<8x256xf32>
    %66 = arith.addf %61, %65 : vector<8x256xf32>
    %67 = vector.extract_strided_slice %22 {offsets = [0, 18], sizes = [4, 256], strides = [1, 1]} : vector<4x290xf32> to vector<4x256xf32>
    %c15_i32_21 = arith.constant 15 : i32
    %68 = vector.broadcast %c15_i32_21 : i32 to vector<1x256xi32>
    %69 = arith.cmpi slt, %16, %68 : vector<1x256xi32>
    %cst_22 = arith.constant 0.000000e+00 : f32
    %70 = vector.shape_cast %69 : vector<1x256xi1> to vector<1x256xi1>
    %71 = vector.broadcast %70 : vector<1x256xi1> to vector<4x256xi1>
    %72 = vector.broadcast %cst_22 : f32 to vector<4x256xf32>
    %73 = arith.select %71, %67, %72 : vector<4x256xi1>, vector<4x256xf32>
    %74 = vector.extract_strided_slice %19 {offsets = [5, 0, 0], sizes = [1, 8, 4], strides = [1, 1, 1]} : vector<9x8x4xf32> to vector<1x8x4xf32>
    %75 = vector.shape_cast %74 : vector<1x8x4xf32> to vector<8x4xf32>
    %cst_23 = arith.constant dense<0.000000e+00> : vector<8x256xf32>
    %76 = tpu.matmul %75, %73, %cst_23 {dimension_numbers = #tpu.dot_dimension_numbers<[1], [0], [0], [1], [0, 0, 1, 1], [], []>} : vector<8x4xf32>, vector<4x256xf32>, vector<8x256xf32> -> vector<8x256xf32>
    %77 = arith.addf %66, %76 : vector<8x256xf32>
    %78 = vector.extract_strided_slice %22 {offsets = [0, 32], sizes = [4, 256], strides = [1, 1]} : vector<4x290xf32> to vector<4x256xf32>
    %c1_i32_24 = arith.constant 1 : i32
    %79 = vector.broadcast %c1_i32_24 : i32 to vector<1x256xi32>
    %80 = arith.cmpi sge, %16, %79 : vector<1x256xi32>
    %cst_25 = arith.constant 0.000000e+00 : f32
    %81 = vector.shape_cast %80 : vector<1x256xi1> to vector<1x256xi1>
    %82 = vector.broadcast %81 : vector<1x256xi1> to vector<4x256xi1>
    %83 = vector.broadcast %cst_25 : f32 to vector<4x256xf32>
    %84 = arith.select %82, %78, %83 : vector<4x256xi1>, vector<4x256xf32>
    %85 = vector.extract_strided_slice %19 {offsets = [6, 0, 0], sizes = [1, 8, 4], strides = [1, 1, 1]} : vector<9x8x4xf32> to vector<1x8x4xf32>
    %86 = vector.shape_cast %85 : vector<1x8x4xf32> to vector<8x4xf32>
    %cst_26 = arith.constant dense<0.000000e+00> : vector<8x256xf32>
    %87 = tpu.matmul %86, %84, %cst_26 {dimension_numbers = #tpu.dot_dimension_numbers<[1], [0], [0], [1], [0, 0, 1, 1], [], []>} : vector<8x4xf32>, vector<4x256xf32>, vector<8x256xf32> -> vector<8x256xf32>
    %88 = arith.addf %77, %87 : vector<8x256xf32>
    %89 = vector.extract_strided_slice %22 {offsets = [0, 33], sizes = [4, 256], strides = [1, 1]} : vector<4x290xf32> to vector<4x256xf32>
    %90 = vector.extract_strided_slice %19 {offsets = [7, 0, 0], sizes = [1, 8, 4], strides = [1, 1, 1]} : vector<9x8x4xf32> to vector<1x8x4xf32>
    %91 = vector.shape_cast %90 : vector<1x8x4xf32> to vector<8x4xf32>
    %cst_27 = arith.constant dense<0.000000e+00> : vector<8x256xf32>
    %92 = tpu.matmul %91, %89, %cst_27 {dimension_numbers = #tpu.dot_dimension_numbers<[1], [0], [0], [1], [0, 0, 1, 1], [], []>} : vector<8x4xf32>, vector<4x256xf32>, vector<8x256xf32> -> vector<8x256xf32>
    %93 = arith.addf %88, %92 : vector<8x256xf32>
    %94 = vector.extract_strided_slice %22 {offsets = [0, 34], sizes = [4, 256], strides = [1, 1]} : vector<4x290xf32> to vector<4x256xf32>
    %c15_i32_28 = arith.constant 15 : i32
    %95 = vector.broadcast %c15_i32_28 : i32 to vector<1x256xi32>
    %96 = arith.cmpi slt, %16, %95 : vector<1x256xi32>
    %cst_29 = arith.constant 0.000000e+00 : f32
    %97 = vector.shape_cast %96 : vector<1x256xi1> to vector<1x256xi1>
    %98 = vector.broadcast %97 : vector<1x256xi1> to vector<4x256xi1>
    %99 = vector.broadcast %cst_29 : f32 to vector<4x256xf32>
    %100 = arith.select %98, %94, %99 : vector<4x256xi1>, vector<4x256xf32>
    %101 = vector.extract_strided_slice %19 {offsets = [8, 0, 0], sizes = [1, 8, 4], strides = [1, 1, 1]} : vector<9x8x4xf32> to vector<1x8x4xf32>
    %102 = vector.shape_cast %101 : vector<1x8x4xf32> to vector<8x4xf32>
    %cst_30 = arith.constant dense<0.000000e+00> : vector<8x256xf32>
    %103 = tpu.matmul %102, %100, %cst_30 {dimension_numbers = #tpu.dot_dimension_numbers<[1], [0], [0], [1], [0, 0, 1, 1], [], []>} : vector<8x4xf32>, vector<4x256xf32>, vector<8x256xf32> -> vector<8x256xf32>
    %104 = arith.addf %93, %103 : vector<8x256xf32>
    %105 = vector.broadcast %20 : vector<8x1xf32> to vector<8x256xf32>
    %106 = arith.addf %104, %105 : vector<8x256xf32>
    %cst_31 = arith.constant 0.000000e+00 : f32
    %107 = vector.broadcast %cst_31 : f32 to vector<8x256xf32>
    %108 = arith.cmpf oge, %106, %107 : vector<8x256xf32>
    %cst_32 = arith.constant 2.000000e-01 : f32
    %109 = vector.broadcast %cst_32 : f32 to vector<8x256xf32>
    %110 = arith.mulf %109, %106 : vector<8x256xf32>
    %111 = arith.select %108, %106, %110 : vector<8x256xi1>, vector<8x256xf32>
    %c0_33 = arith.constant 0 : index
    %c0_34 = arith.constant 0 : index
    %c0_35 = arith.constant 0 : index
    %112 = vector.load %arg6[%c0_33, %c0_34, %c0_35] : memref<1x8x256xf32, #tpu.memory_space<vmem>>, vector<1x8x256xf32>
    %113 = vector.shape_cast %112 : vector<1x8x256xf32> to vector<8x256xf32>
    %114 = vector.shape_cast %111 : vector<8x256xf32> to vector<1x8x256xf32>
    tpu.vector_store %arg6[%c0_33, %c0_34, %c0_35], %114 {strides = array<i32>} : memref<1x8x256xf32, #tpu.memory_space<vmem>>, vector<1x8x256xf32>,
    %c0_36 = arith.constant 0 : index
    %c0_37 = arith.constant 0 : index
    %c0_38 = arith.constant 0 : index
    %115 = vector.load %arg4[%c0_36, %c0_37, %c0_38] : memref<9x2x8xf32, #tpu.memory_space<vmem>>, vector<9x2x8xf32>
    %c0_39 = arith.constant 0 : index
    %c0_40 = arith.constant 0 : index
    %116 = vector.load %arg5[%c0_39, %c0_40] : memref<2x1xf32, #tpu.memory_space<vmem>>, vector<2x1xf32>
    %cst_41 = arith.constant 0.000000e+00 : f32
    %117 = vector.broadcast %cst_41 : f32 to vector<8x17xf32>
    %118 = tpu.concatenate %117, %111, %117 in 1 : vector<8x17xf32>, vector<8x256xf32>, vector<8x17xf32> -> vector<8x290xf32>
    %cst_42 = arith.constant 0.000000e+00 : f32
    %119 = vector.broadcast %cst_42 : f32 to vector<2x256xf32>
    %120 = vector.extract_strided_slice %118 {offsets = [0, 0], sizes = [8, 256], strides = [1, 1]} : vector<8x290xf32> to vector<8x256xf32>
    %c1_i32_43 = arith.constant 1 : i32
    %121 = vector.broadcast %c1_i32_43 : i32 to vector<1x256xi32>
    %122 = arith.cmpi sge, %16, %121 : vector<1x256xi32>
    %cst_44 = arith.constant 0.000000e+00 : f32
    %123 = vector.shape_cast %122 : vector<1x256xi1> to vector<1x256xi1>
    %124 = vector.broadcast %123 : vector<1x256xi1> to vector<8x256xi1>
    %125 = vector.broadcast %cst_44 : f32 to vector<8x256xf32>
    %126 = arith.select %124, %120, %125 : vector<8x256xi1>, vector<8x256xf32>
    %127 = vector.extract_strided_slice %115 {offsets = [0, 0, 0], sizes = [1, 2, 8], strides = [1, 1, 1]} : vector<9x2x8xf32> to vector<1x2x8xf32>
    %128 = vector.shape_cast %127 : vector<1x2x8xf32> to vector<2x8xf32>
    %cst_45 = arith.constant dense<0.000000e+00> : vector<2x256xf32>
    %129 = tpu.matmul %128, %126, %cst_45 {dimension_numbers = #tpu.dot_dimension_numbers<[1], [0], [0], [1], [0, 0, 1, 1], [], []>} : vector<2x8xf32>, vector<8x256xf32>, vector<2x256xf32> -> vector<2x256xf32>
    %130 = arith.addf %119, %129 : vector<2x256xf32>
    %131 = vector.extract_strided_slice %118 {offsets = [0, 1], sizes = [8, 256], strides = [1, 1]} : vector<8x290xf32> to vector<8x256xf32>
    %132 = vector.extract_strided_slice %115 {offsets = [1, 0, 0], sizes = [1, 2, 8], strides = [1, 1, 1]} : vector<9x2x8xf32> to vector<1x2x8xf32>
    %133 = vector.shape_cast %132 : vector<1x2x8xf32> to vector<2x8xf32>
    %cst_46 = arith.constant dense<0.000000e+00> : vector<2x256xf32>
    %134 = tpu.matmul %133, %131, %cst_46 {dimension_numbers = #tpu.dot_dimension_numbers<[1], [0], [0], [1], [0, 0, 1, 1], [], []>} : vector<2x8xf32>, vector<8x256xf32>, vector<2x256xf32> -> vector<2x256xf32>
    %135 = arith.addf %130, %134 : vector<2x256xf32>
    %136 = vector.extract_strided_slice %118 {offsets = [0, 2], sizes = [8, 256], strides = [1, 1]} : vector<8x290xf32> to vector<8x256xf32>
    %c15_i32_47 = arith.constant 15 : i32
    %137 = vector.broadcast %c15_i32_47 : i32 to vector<1x256xi32>
    %138 = arith.cmpi slt, %16, %137 : vector<1x256xi32>
    %cst_48 = arith.constant 0.000000e+00 : f32
    %139 = vector.shape_cast %138 : vector<1x256xi1> to vector<1x256xi1>
    %140 = vector.broadcast %139 : vector<1x256xi1> to vector<8x256xi1>
    %141 = vector.broadcast %cst_48 : f32 to vector<8x256xf32>
    %142 = arith.select %140, %136, %141 : vector<8x256xi1>, vector<8x256xf32>
    %143 = vector.extract_strided_slice %115 {offsets = [2, 0, 0], sizes = [1, 2, 8], strides = [1, 1, 1]} : vector<9x2x8xf32> to vector<1x2x8xf32>
    %144 = vector.shape_cast %143 : vector<1x2x8xf32> to vector<2x8xf32>
    %cst_49 = arith.constant dense<0.000000e+00> : vector<2x256xf32>
    %145 = tpu.matmul %144, %142, %cst_49 {dimension_numbers = #tpu.dot_dimension_numbers<[1], [0], [0], [1], [0, 0, 1, 1], [], []>} : vector<2x8xf32>, vector<8x256xf32>, vector<2x256xf32> -> vector<2x256xf32>
    %146 = arith.addf %135, %145 : vector<2x256xf32>
    %147 = vector.extract_strided_slice %118 {offsets = [0, 16], sizes = [8, 256], strides = [1, 1]} : vector<8x290xf32> to vector<8x256xf32>
    %c1_i32_50 = arith.constant 1 : i32
    %148 = vector.broadcast %c1_i32_50 : i32 to vector<1x256xi32>
    %149 = arith.cmpi sge, %16, %148 : vector<1x256xi32>
    %cst_51 = arith.constant 0.000000e+00 : f32
    %150 = vector.shape_cast %149 : vector<1x256xi1> to vector<1x256xi1>
    %151 = vector.broadcast %150 : vector<1x256xi1> to vector<8x256xi1>
    %152 = vector.broadcast %cst_51 : f32 to vector<8x256xf32>
    %153 = arith.select %151, %147, %152 : vector<8x256xi1>, vector<8x256xf32>
    %154 = vector.extract_strided_slice %115 {offsets = [3, 0, 0], sizes = [1, 2, 8], strides = [1, 1, 1]} : vector<9x2x8xf32> to vector<1x2x8xf32>
    %155 = vector.shape_cast %154 : vector<1x2x8xf32> to vector<2x8xf32>
    %cst_52 = arith.constant dense<0.000000e+00> : vector<2x256xf32>
    %156 = tpu.matmul %155, %153, %cst_52 {dimension_numbers = #tpu.dot_dimension_numbers<[1], [0], [0], [1], [0, 0, 1, 1], [], []>} : vector<2x8xf32>, vector<8x256xf32>, vector<2x256xf32> -> vector<2x256xf32>
    %157 = arith.addf %146, %156 : vector<2x256xf32>
    %158 = vector.extract_strided_slice %118 {offsets = [0, 17], sizes = [8, 256], strides = [1, 1]} : vector<8x290xf32> to vector<8x256xf32>
    %159 = vector.extract_strided_slice %115 {offsets = [4, 0, 0], sizes = [1, 2, 8], strides = [1, 1, 1]} : vector<9x2x8xf32> to vector<1x2x8xf32>
    %160 = vector.shape_cast %159 : vector<1x2x8xf32> to vector<2x8xf32>
    %cst_53 = arith.constant dense<0.000000e+00> : vector<2x256xf32>
    %161 = tpu.matmul %160, %158, %cst_53 {dimension_numbers = #tpu.dot_dimension_numbers<[1], [0], [0], [1], [0, 0, 1, 1], [], []>} : vector<2x8xf32>, vector<8x256xf32>, vector<2x256xf32> -> vector<2x256xf32>
    %162 = arith.addf %157, %161 : vector<2x256xf32>
    %163 = vector.extract_strided_slice %118 {offsets = [0, 18], sizes = [8, 256], strides = [1, 1]} : vector<8x290xf32> to vector<8x256xf32>
    %c15_i32_54 = arith.constant 15 : i32
    %164 = vector.broadcast %c15_i32_54 : i32 to vector<1x256xi32>
    %165 = arith.cmpi slt, %16, %164 : vector<1x256xi32>
    %cst_55 = arith.constant 0.000000e+00 : f32
    %166 = vector.shape_cast %165 : vector<1x256xi1> to vector<1x256xi1>
    %167 = vector.broadcast %166 : vector<1x256xi1> to vector<8x256xi1>
    %168 = vector.broadcast %cst_55 : f32 to vector<8x256xf32>
    %169 = arith.select %167, %163, %168 : vector<8x256xi1>, vector<8x256xf32>
    %170 = vector.extract_strided_slice %115 {offsets = [5, 0, 0], sizes = [1, 2, 8], strides = [1, 1, 1]} : vector<9x2x8xf32> to vector<1x2x8xf32>
    %171 = vector.shape_cast %170 : vector<1x2x8xf32> to vector<2x8xf32>
    %cst_56 = arith.constant dense<0.000000e+00> : vector<2x256xf32>
    %172 = tpu.matmul %171, %169, %cst_56 {dimension_numbers = #tpu.dot_dimension_numbers<[1], [0], [0], [1], [0, 0, 1, 1], [], []>} : vector<2x8xf32>, vector<8x256xf32>, vector<2x256xf32> -> vector<2x256xf32>
    %173 = arith.addf %162, %172 : vector<2x256xf32>
    %174 = vector.extract_strided_slice %118 {offsets = [0, 32], sizes = [8, 256], strides = [1, 1]} : vector<8x290xf32> to vector<8x256xf32>
    %c1_i32_57 = arith.constant 1 : i32
    %175 = vector.broadcast %c1_i32_57 : i32 to vector<1x256xi32>
    %176 = arith.cmpi sge, %16, %175 : vector<1x256xi32>
    %cst_58 = arith.constant 0.000000e+00 : f32
    %177 = vector.shape_cast %176 : vector<1x256xi1> to vector<1x256xi1>
    %178 = vector.broadcast %177 : vector<1x256xi1> to vector<8x256xi1>
    %179 = vector.broadcast %cst_58 : f32 to vector<8x256xf32>
    %180 = arith.select %178, %174, %179 : vector<8x256xi1>, vector<8x256xf32>
    %181 = vector.extract_strided_slice %115 {offsets = [6, 0, 0], sizes = [1, 2, 8], strides = [1, 1, 1]} : vector<9x2x8xf32> to vector<1x2x8xf32>
    %182 = vector.shape_cast %181 : vector<1x2x8xf32> to vector<2x8xf32>
    %cst_59 = arith.constant dense<0.000000e+00> : vector<2x256xf32>
    %183 = tpu.matmul %182, %180, %cst_59 {dimension_numbers = #tpu.dot_dimension_numbers<[1], [0], [0], [1], [0, 0, 1, 1], [], []>} : vector<2x8xf32>, vector<8x256xf32>, vector<2x256xf32> -> vector<2x256xf32>
    %184 = arith.addf %173, %183 : vector<2x256xf32>
    %185 = vector.extract_strided_slice %118 {offsets = [0, 33], sizes = [8, 256], strides = [1, 1]} : vector<8x290xf32> to vector<8x256xf32>
    %186 = vector.extract_strided_slice %115 {offsets = [7, 0, 0], sizes = [1, 2, 8], strides = [1, 1, 1]} : vector<9x2x8xf32> to vector<1x2x8xf32>
    %187 = vector.shape_cast %186 : vector<1x2x8xf32> to vector<2x8xf32>
    %cst_60 = arith.constant dense<0.000000e+00> : vector<2x256xf32>
    %188 = tpu.matmul %187, %185, %cst_60 {dimension_numbers = #tpu.dot_dimension_numbers<[1], [0], [0], [1], [0, 0, 1, 1], [], []>} : vector<2x8xf32>, vector<8x256xf32>, vector<2x256xf32> -> vector<2x256xf32>
    %189 = arith.addf %184, %188 : vector<2x256xf32>
    %190 = vector.extract_strided_slice %118 {offsets = [0, 34], sizes = [8, 256], strides = [1, 1]} : vector<8x290xf32> to vector<8x256xf32>
    %c15_i32_61 = arith.constant 15 : i32
    %191 = vector.broadcast %c15_i32_61 : i32 to vector<1x256xi32>
    %192 = arith.cmpi slt, %16, %191 : vector<1x256xi32>
    %cst_62 = arith.constant 0.000000e+00 : f32
    %193 = vector.shape_cast %192 : vector<1x256xi1> to vector<1x256xi1>
    %194 = vector.broadcast %193 : vector<1x256xi1> to vector<8x256xi1>
    %195 = vector.broadcast %cst_62 : f32 to vector<8x256xf32>
    %196 = arith.select %194, %190, %195 : vector<8x256xi1>, vector<8x256xf32>
    %197 = vector.extract_strided_slice %115 {offsets = [8, 0, 0], sizes = [1, 2, 8], strides = [1, 1, 1]} : vector<9x2x8xf32> to vector<1x2x8xf32>
    %198 = vector.shape_cast %197 : vector<1x2x8xf32> to vector<2x8xf32>
    %cst_63 = arith.constant dense<0.000000e+00> : vector<2x256xf32>
    %199 = tpu.matmul %198, %196, %cst_63 {dimension_numbers = #tpu.dot_dimension_numbers<[1], [0], [0], [1], [0, 0, 1, 1], [], []>} : vector<2x8xf32>, vector<8x256xf32>, vector<2x256xf32> -> vector<2x256xf32>
    %200 = arith.addf %189, %199 : vector<2x256xf32>
    %201 = vector.broadcast %116 : vector<2x1xf32> to vector<2x256xf32>
    %202 = arith.addf %200, %201 : vector<2x256xf32>
    %c0_64 = arith.constant 0 : index
    %c0_65 = arith.constant 0 : index
    %c0_66 = arith.constant 0 : index
    %203 = vector.load %arg7[%c0_64, %c0_65, %c0_66] : memref<1x2x256xf32, #tpu.memory_space<vmem>>, vector<1x2x256xf32>
    %204 = vector.shape_cast %203 : vector<1x2x256xf32> to vector<2x256xf32>
    %205 = vector.shape_cast %202 : vector<2x256xf32> to vector<1x2x256xf32>
    tpu.vector_store %arg7[%c0_64, %c0_65, %c0_66], %205 {strides = array<i32>} : memref<1x2x256xf32, #tpu.memory_space<vmem>>, vector<1x2x256xf32>,
    return
  }
  func.func @transform_0(%arg0: i32) -> (i32, i32, i32) {
    %c0_i32 = arith.constant 0 : i32
    %c0_i32_0 = arith.constant 0 : i32
    %c0_i32_1 = arith.constant 0 : i32
    return %arg0, %c0_i32, %c0_i32_0 : i32, i32, i32
  }
  func.func @transform_1(%arg0: i32) -> (i32, i32, i32) {
    %c0_i32 = arith.constant 0 : i32
    %c0_i32_0 = arith.constant 0 : i32
    %c0_i32_1 = arith.constant 0 : i32
    %c0_i32_2 = arith.constant 0 : i32
    return %c0_i32, %c0_i32_0, %c0_i32_1 : i32, i32, i32
  }
  func.func @transform_2(%arg0: i32) -> (i32, i32) {
    %c0_i32 = arith.constant 0 : i32
    %c0_i32_0 = arith.constant 0 : i32
    %c0_i32_1 = arith.constant 0 : i32
    return %c0_i32, %c0_i32_0 : i32, i32
  }
  func.func @transform_3(%arg0: i32) -> (i32, i32, i32) {
    %c0_i32 = arith.constant 0 : i32
    %c0_i32_0 = arith.constant 0 : i32
    %c0_i32_1 = arith.constant 0 : i32
    %c0_i32_2 = arith.constant 0 : i32
    return %c0_i32, %c0_i32_0, %c0_i32_1 : i32, i32, i32
  }
  func.func @transform_4(%arg0: i32) -> (i32, i32) {
    %c0_i32 = arith.constant 0 : i32
    %c0_i32_0 = arith.constant 0 : i32
    %c0_i32_1 = arith.constant 0 : i32
    return %c0_i32, %c0_i32_0 : i32, i32
  }
  func.func @transform_5(%arg0: i32) -> (i32, i32, i32) {
    %c0_i32 = arith.constant 0 : i32
    %c0_i32_0 = arith.constant 0 : i32
    %c0_i32_1 = arith.constant 0 : i32
    return %arg0, %c0_i32, %c0_i32_0 : i32, i32, i32
  }
  func.func @transform_6(%arg0: i32) -> (i32, i32, i32) {
    %c0_i32 = arith.constant 0 : i32
    %c0_i32_0 = arith.constant 0 : i32
    %c0_i32_1 = arith.constant 0 : i32
    return %arg0, %c0_i32, %c0_i32_0 : i32, i32, i32
  }
}

</mosaic_0001>

<bundles_post_ra>
// kernel: tpu_custom_call.1
= control target key start
LH: loop header
LB: loop body
LE: loop exit
PB: predicated region body
PF: predicated region fallthrough
CT: control target
= control target key end

     0   :  { %12 = vsyncpa [#allocation3], 0  ;;  %s2820_s0 = inlined_call_operand.vmem [shape: f32[2,4,256], index: 0, kind: input, shape index: {}]   ;;  %s2821_s1 = inlined_call_operand.vmem [shape: f32[9,8,4], index: 1, kind: input, shape index: {}]   ;;  %s2822_s2 = inlined_call_operand.vmem [shape: f32[8,1], index: 2, kind: input, shape index: {}]   ;;  %s2823_s3 = inlined_call_operand.vmem [shape: f32[9,2,8], index: 3, kind: input, shape index: {}]   ;;  %s2824_s4 = inlined_call_operand.vmem [shape: f32[2,1], index: 4, kind: input, shape index: {}]   ;;  %s2825_s5 = inlined_call_operand.hbm [shape: f32[2,8,256], index: 5, kind: output, shape index: {0}]   ;;  %s2826_s6 = inlined_call_operand.hbm [shape: f32[2,2,256], index: 6, kind: output, shape index: {1}]  }
   0x1   :  { %14 = vsyncpa [#allocation3 + $0x1], 0 }
   0x2   :  { %15 = vsyncpa [#allocation5], 0 }
   0x3   :  { %17 = vsyncpa [#allocation5 + $0x1], 0  ;;  %s2407_s21 = smov 0   ;;  %s2409_s22 = smov 0  }
   0x4   :  { %s2411_s23 = smov 0   ;;  %s2413_s24 = smov 0  }
   0x5 LB: > { %s2428_s25 = sadd.s32 4294967295, %s2357_s24   ;;  %s2106_s26 = sadd.s32 4294967294, %s2357_s24   ;;  %s2357_s24 = sphi %s2413_s24, %s2840_s24   ;;  %s2353_s23 = sphi %s2411_s23, %s2839_s23   ;;  %s2349_s22 = sphi %s2409_s22, %s2838_s22   ;;  %s2345_s21 = sphi %s2407_s21, %s2837_s21  }
   0x6   : > { %s2432_s27 = sadd.s32 1, %s2357_s24   ;;  %s140_s28 = sadd.s32 1, %s2353_s23 }
   0x7   : > { %s137_s29 = ssub.s32 %s2357_s24, %s2432_s27  ;;  %p150_p0 = scmp.ne.s32.totalorder %s2353_s23, %s2349_s22 }
   0x8   : > { %p138_p1 = scmp.eq.s32.totalorder %s137_s29, 0  ;;  %p151_p2 = scmp.eq.s32.totalorder %s2428_s25, 1 }
   0x9   : > { %p156_p3 = scmp.ne.s32.totalorder %s2349_s22, %s2345_s21  ;;  %p157_p4 = scmp.eq.s32.totalorder %s2106_s26, 1 }
   0xa   : > { %s2443_s30 = scalar_select %p138_p1, %s2353_s23, %s140_s28  }
   0xb   : > { %p2445_p5 = por %p151_p2, %p150_p0  ;;  %p2449_p6 = por %p157_p4, %p156_p3 }
   0xc   : > { %p2109_p7 = scmp.ge.s32.totalorder %s2357_s24, 1  ;;  %p221_p8 = scmp.lt.s32.totalorder %s2357_s24, 3 }
   0xe   : > { %p222_p9 = pnand %p2109_p7, %p221_p8 }
   0xf   : > { %p256_p10 = scmp.lt.s32.totalorder (!%p222_p9), %s2428_s25, 1  ;;  %s2359_s14 = smov (!%p222_p9), 17   ;;  %vm305_vm0 = vcmask (!%p222_p9), 138240   ;;  %v2360_v2 = vmov (!%p222_p9), 0.0   ;;  %v298_v8 = vld [vmem:[%s2822_s2] sm:$0xff] (!%p222_p9)  ;;  %v2369_v9 = vmov (!%p222_p9), 0   ;;  %v261_v10 = vlaneseq (!%p222_p9) }
  0x10   : > { %225 = sbr.rel (%p222_p9) target bundleno = 1087 (0x43f), region = 40  ;;  %404 = vmatprep.mubr.f32.mxu0 (!%p222_p9), %v2360_v2  ;;  %1269 = vmatprep.mubr.f32.mxu1 (!%p222_p9), %v2360_v2  ;;  %s2361_s15 = smov (!%p222_p9), 127   ;;  %vm328_vm1 = vcmask (!%p222_p9), 1039360   ;;  %vm335_vm2 = vcmask (!%p222_p9), 1043456   ;;  %v290_v22 = vld [vmem:[%s2821_s1 + $0x8] sm:$0xff] (!%p222_p9)  ;;  %vm331_vm4 = vcmask (!%p222_p9), 31744  }
  0x11   : > { %s2362_s16 = smov (!%p222_p9), 126   ;;  %s2363_s17 = smov (!%p222_p9), 112   ;;  %2261 = vset.pattern.permute.xlu0 (!%p222_p9), %v2369_v9  ;;  %v262_v11 = vand.u32 (!%p222_p9), 127, %v261_v10  ;;  %vm503_vm6 = vcmask (!%p222_p9), 1031168   ;;  %v289_v35 = vld [vmem:[%s2821_s1] sm:$0xff] (!%p222_p9)  ;;  %vm598_vm9 = vcmask (!%p222_p9), 916480  }
  0x12   : > { %s2364_s18 = smov (!%p222_p9), 111   ;;  %s2365_s19 = smov (!%p222_p9), 110   ;;  %v291_v43 = vld [vmem:[%s2821_s1 + $0x10] sm:$0xff] (!%p222_p9)  ;;  %vm693_vm10 = vcmask (!%p222_p9), 908288   ;;  %vm782_vm11 = vcmask (!%p222_p9), 900096   ;;  %v292_v50 = vld [vmem:[%s2821_s1 + $0x18] sm:$0xff] (!%p222_p9) }
  0x13   : > { %s2366_s20 = smov (!%p222_p9), 96   ;;  %s2367_s26 = smov (!%p222_p9), 95   ;;  %v263_v13 = vadd.s32 (!%p222_p9), 128, %v262_v11  ;;  %v268_v17 = vand.u32 (!%p222_p9), 15, %v262_v11  ;;  %vm877_vm12 = vcmask (!%p222_p9), 785408   ;;  %v293_v57 = vld [vmem:[%s2821_s1 + $0x20] sm:$0xff] (!%p222_p9) }
  0x14   : > { %s2368_s28 = smov (!%p222_p9), 94   ;;  %vm972_vm13 = vcmask (!%p222_p9), 777216   ;;  %vm1061_vm14 = vcmask (!%p222_p9), 769024   ;;  %v1171_v19 = vld [vmem:[%s2823_s3 + $0xc] sm:$0x3] (!%p222_p9) }
  0x15   : > { %v275_v16 = vand.u32 (!%p222_p9), 15, %v263_v13  ;;  %vm2512_vm5 = vcmp.ge.s32.totalorder (!%p222_p9), %v268_v17, 1  ;;  %vm2536_vm8 = vcmp.lt.s32.totalorder (!%p222_p9), %v268_v17, 15  ;;  %v1173_v25 = vld [vmem:[%s2823_s3 + $0x10] sm:$0x3] (!%p222_p9) }
  0x17   : > { %s257_s9 = scalar_select %p256_p10, %s2428_s25, 1  ;;  %vm2504_vm3 = vcmp.ge.s32.totalorder %v275_v16, 1  ;;  %vm2519_vm7 = vcmp.lt.s32.totalorder %v275_v16, 15  ;;  %v297_v16 = vld [vmem:[%s2821_s1 + $0x40] sm:$0xff] }
  0x19   : > { %s2171_s10 = sshll.u32 %s257_s9, 3 }
  0x1a   : > { %s260_s13 = scalar_lea.vmem %s2820_s0, %s2171_s10  ;;  %s2624_s10 = sand.u32 1, %s2349_s22  }
  0x1b   : > { %v288_v0 = vld [vmem:[%s260_s13] sm:$0xff]  ;;  %s2110_s11 = sshll.u32 %s2624_s10, 4 }
  0x1c   : > { %301 = vrot.lane.b32.xlu0 %v288_v0, %s2359_s14  ;;  %v300_v1 = vcombine.high %v288_v0, %v288_v0  ;;  %s2628_s12 = scalar_lea.vmem [#allocation2], %s2110_s11  ;;  %s1982_s11 = scalar_lea.sflag [#allocation3], %s2624_s10 }
  0x1d   : > { %s2001_s9 = sshll.u32 %s2628_s12, 4  ;;  %s2002_s9 = int_to_ptr.vmem [resolvable:$true] %s2001_s9 }
  0x20   : > { %303 = vrot.lane.b32.xlu0 %v300_v1, %s2359_s14  ;;  %v294_v1 = vld [vmem:[%s2821_s1 + $0x28] sm:$0xff] }
  0x8e   : > { %v302_v3 = vpop.permute.xlu0 %301 }
  0x8f   : > { %v2465_v4 = vsel %vm305_vm0, 0.0, %v302_v3 }
  0x90   : > { %322 = vrot.lane.b32.xlu0 %v2465_v4, %s2361_s15  ;;  %v318_v28 = vsel %vm2512_vm5, %v2465_v4, 0.0 }
  0x92   : > { %v304_v5 = vpop.permute.xlu0 %303 }
  0x93   : > { %v306_v6 = vsel %vm305_vm0, %v302_v3, %v304_v5  ;;  %v311_v7 = vsel %vm305_vm0, %v304_v5, 0.0 }
  0x94   : > { %501 = vrot.lane.b32.xlu0 %v311_v7, %s2362_s16  ;;  %324 = vrot.lane.b32.xlu1 %v306_v6, %s2361_s15  ;;  %v319_v26 = vsel %vm2504_vm3, %v306_v6, 0.0 }
  0x98   : > { %594 = vrot.lane.b32.xlu0 %v306_v6, %s2363_s17  ;;  %326 = vrot.lane.b32.xlu1 %v311_v7, %s2361_s15 }
  0x9c   : > { %592 = vrot.lane.b32.xlu0 %v2465_v4, %s2363_s17  ;;  %499 = vrot.lane.b32.xlu1 %v306_v6, %s2362_s16 }
  0xa0   : > { %691 = vrot.lane.b32.xlu0 %v311_v7, %s2364_s18  ;;  %497 = vrot.lane.b32.xlu1 %v2465_v4, %s2362_s16 }
  0xa4   : > { %778 = vrot.lane.b32.xlu0 %v306_v6, %s2365_s19  ;;  %596 = vrot.lane.b32.xlu1 %v311_v7, %s2363_s17 }
  0xa8   : > { %776 = vrot.lane.b32.xlu0 %v2465_v4, %s2365_s19  ;;  %689 = vrot.lane.b32.xlu1 %v306_v6, %s2364_s18 }
  0xac   : > { %875 = vrot.lane.b32.xlu0 %v311_v7, %s2366_s20  ;;  %687 = vrot.lane.b32.xlu1 %v2465_v4, %s2364_s18 }
  0xb0   : > { %968 = vrot.lane.b32.xlu0 %v306_v6, %s2367_s26  ;;  %780 = vrot.lane.b32.xlu1 %v311_v7, %s2365_s19 }
  0xb4   : > { %966 = vrot.lane.b32.xlu0 %v2465_v4, %s2367_s26  ;;  %873 = vrot.lane.b32.xlu1 %v306_v6, %s2366_s20 }
  0xb8   : > { %1059 = vrot.lane.b32.xlu0 %v311_v7, %s2368_s28  ;;  %871 = vrot.lane.b32.xlu1 %v2465_v4, %s2366_s20 }
  0xbc   : > { %970 = vrot.lane.b32.xlu1 %v311_v7, %s2367_s26  ;;  %1152 = vperm.xlu0 %2261, %v298_v8   ;;  %v295_v8 = vld [vmem:[%s2821_s1 + $0x30] sm:$0xff] }
  0xc0   : > { %1057 = vrot.lane.b32.xlu1 %v306_v6, %s2368_s28 }
  0xc4   : > { %1055 = vrot.lane.b32.xlu1 %v2465_v4, %s2368_s28 }
 0x102   : > { %v323_v12 = vpop.permute.xlu0 %322 }
 0x106   : > { %v325_v14 = vpop.permute.xlu1 %324  ;;  %v502_v15 = vpop.permute.xlu0 %501 }
 0x107   : > { %v329_v24 = vsel %vm328_vm1, %v323_v12, %v325_v14 }
 0x10a   : > { %v327_v18 = vpop.permute.xlu1 %326  ;;  %v595_v20 = vpop.permute.xlu0 %594 }
 0x10b   : > { %v330_v21 = vsel %vm328_vm1, %v325_v14, %v327_v18  ;;  %v296_v14 = vld [vmem:[%s2821_s1 + $0x38] sm:$0xff] }
 0x10c   : > { %2114 = vmatprep.subr.msk.mxu0 %vm335_vm2, %v330_v21 }
 0x10d   : > { %2115 = vmatpush1.msk.msra.mxu0 %vm335_vm2, %v329_v24 }
 0x10e   : > { %v500_v27 = vpop.permute.xlu1 %499  ;;  %2116 = vmatmul.mubr.msk.f32.vlgmr.msra.gmra.mrb[0].mxu0 %vm331_vm4, %v290_v22  ;;  %2117 = vmatprep.subr.msk.mxu0 %vm335_vm2, %v319_v26  ;;  %v593_v31 = vpop.permute.xlu0 %592 }
 0x10f   : > { %v505_v29 = vsel %vm503_vm6, %v500_v27, %v502_v15  ;;  %2118 = vmatpush1.msk.msra.mxu0 %vm335_vm2, %v318_v28  ;;  %484 = vmatprep.mubr.f32.mxu0 %v2360_v2  ;;  %v599_v42 = vsel %vm598_vm9, %v593_v31, %v595_v20 }
 0x110   : > { %v509_v30 = vsel %vm2519_vm7, %v505_v29, 0.0  ;;  %v603_v45 = vsel %vm2512_vm5, %v599_v42, 0.0 }
 0x111   : > { %2120 = vmatprep.subr.msk.mxu0 %vm335_vm2, %v509_v30 }
 0x112   : > { %v498_v33 = vpop.permute.xlu1 %497  ;;  %v692_v38 = vpop.permute.xlu0 %691 }
 0x113   : > { %v504_v34 = vsel %vm503_vm6, %v498_v33, %v500_v27 }
 0x114   : > { %v508_v36 = vsel %vm2536_vm8, %v504_v34, 0.0 }
 0x116   : > { %v597_v37 = vpop.permute.xlu1 %596  ;;  %2119 = vmatmul.mubr.msk.f32.vlgmr.msra.gmra.mrb[0].mxu0 %vm331_vm4, %v289_v35  ;;  %v779_v44 = vpop.permute.xlu0 %778  ;;  %v1174_v35 = vld [vmem:[%s2824_s4] sm:$0x3] }
 0x117   : > { %v600_v39 = vsel %vm598_vm9, %v595_v20, %v597_v37  ;;  %2121 = vmatpush1.msk.msra.mxu0 %vm335_vm2, %v508_v36  ;;  %583 = vmatprep.mubr.f32.mxu0 %v2360_v2 }
 0x118   : > { %v604_v40 = vsel %vm2504_vm3, %v600_v39, 0.0 }
 0x119   : > { %2123 = vmatprep.subr.msk.mxu0 %vm335_vm2, %v604_v40 }
 0x11a   : > { %v690_v41 = vpop.permute.xlu1 %689  ;;  %v777_v49 = vpop.permute.xlu0 %776 }
 0x11b   : > { %v695_v47 = vsel %vm693_vm10, %v690_v41, %v692_v38  ;;  %v783_v56 = vsel %vm782_vm11, %v777_v49, %v779_v44 }
 0x11c   : > { %v787_v60 = vsel %vm2536_vm8, %v783_v56, 0.0 }
 0x11e   : > { %v688_v46 = vpop.permute.xlu1 %687  ;;  %2122 = vmatmul.mubr.msk.f32.vlgmr.msra.gmra.mrb[0].mxu0 %vm331_vm4, %v291_v43  ;;  %v876_v55 = vpop.permute.xlu0 %875 }
 0x11f   : > { %2124 = vmatpush1.msk.msra.mxu0 %vm335_vm2, %v603_v45  ;;  %678 = vmatprep.mubr.f32.mxu0 %v2360_v2  ;;  %v694_v52 = vsel %vm693_vm10, %v688_v46, %v690_v41  ;;  %v1166_v41 = vld [vmem:[%s2823_s3 + $0x2] sm:$0x3] }
 0x120   : > { %2126 = vmatprep.subr.msk.mxu0 %vm335_vm2, %v695_v47 }
 0x122   : > { %v781_v48 = vpop.permute.xlu1 %780  ;;  %v969_v61 = vpop.permute.xlu0 %968 }
 0x123   : > { %v784_v51 = vsel %vm782_vm11, %v779_v44, %v781_v48  ;;  %v1165_v48 = vld [vmem:[%s2823_s3] sm:$0x3] }
 0x124   : > { %v788_v53 = vsel %vm2519_vm7, %v784_v51, 0.0 }
 0x126   : > { %2125 = vmatmul.mubr.msk.f32.vlgmr.msra.gmra.mrb[0].mxu0 %vm331_vm4, %v292_v50  ;;  %v874_v54 = vpop.permute.xlu1 %873  ;;  %v967_v3 = vpop.permute.xlu0 %966 }
 0x127   : > { %2127 = vmatpush1.msk.msra.mxu0 %vm335_vm2, %v694_v52  ;;  %767 = vmatprep.mubr.f32.mxu0 %v2360_v2  ;;  %v879_v58 = vsel %vm877_vm12, %v874_v54, %v876_v55  ;;  %v973_v10 = vsel %vm972_vm13, %v967_v3, %v969_v61  ;;  %v1169_v3 = vld [vmem:[%s2823_s3 + $0x8] sm:$0x3] }
 0x128   : > { %2129 = vmatprep.subr.msk.mxu0 %vm335_vm2, %v788_v53  ;;  %v883_v62 = vsel %vm2504_vm3, %v879_v58, 0.0 }
 0x12a   : > { %v872_v59 = vpop.permute.xlu1 %871  ;;  %v1060_v7 = vpop.permute.xlu0 %1059 }
 0x12b   : > { %v878_v63 = vsel %vm877_vm12, %v872_v59, %v874_v54  ;;  %v1167_v54 = vld [vmem:[%s2823_s3 + $0x4] sm:$0x3] }
 0x12c   : > { %v882_v4 = vsel %vm2512_vm5, %v878_v63, 0.0 }
 0x12e   : > { %2128 = vmatmul.mubr.msk.f32.vlgmr.msra.gmra.mrb[0].mxu0 %vm331_vm4, %v293_v57  ;;  %v971_v0 = vpop.permute.xlu1 %970 }
 0x12f   : > { %2130 = vmatpush1.msk.msra.mxu0 %vm335_vm2, %v787_v60  ;;  %862 = vmatprep.mubr.f32.mxu0 %v2360_v2  ;;  %v974_v5 = vsel %vm972_vm13, %v969_v61, %v971_v0  ;;  %v1168_v60 = vld [vmem:[%s2823_s3 + $0x6] sm:$0x3] }
 0x130   : > { %2132 = vmatprep.subr.msk.mxu0 %vm335_vm2, %v883_v62 }
 0x132   : > { %v1058_v6 = vpop.permute.xlu1 %1057 }
 0x133   : > { %v1063_v9 = vsel %vm1061_vm14, %v1058_v6, %v1060_v7 }
 0x134   : > { %v1067_v11 = vsel %vm2519_vm7, %v1063_v9, 0.0 }
 0x136   : > { %2131 = vmatmul.mubr.msk.f32.vlgmr.msra.gmra.mrb[0].mxu0 %vm331_vm4, %v294_v1  ;;  %v1056_v12 = vpop.permute.xlu1 %1055 }
 0x137   : > { %2133 = vmatpush1.msk.msra.mxu0 %vm335_vm2, %v882_v4  ;;  %957 = vmatprep.mubr.f32.mxu0 %v2360_v2  ;;  %v1062_v13 = vsel %vm1061_vm14, %v1056_v12, %v1058_v6 }
 0x138   : > { %2135 = vmatprep.subr.msk.mxu0 %vm335_vm2, %v974_v5  ;;  %v1066_v15 = vsel %vm2536_vm8, %v1062_v13, 0.0 }
 0x13b   : > { %v1153_v17 = vpop.permute.xlu0 %1152 }
 0x13e   : > { %2134 = vmatmul.mubr.msk.f32.vlgmr.msra.gmra.mrb[0].mxu0 %vm331_vm4, %v295_v8  ;;  %v1170_v8 = vld [vmem:[%s2823_s3 + $0xa] sm:$0x3] }
 0x13f   : > { %2136 = vmatpush1.msk.msra.mxu0 %vm335_vm2, %v973_v10  ;;  %1046 = vmatprep.mubr.f32.mxu0 %v2360_v2 }
 0x140   : > { %2138 = vmatprep.subr.msk.mxu0 %vm335_vm2, %v1067_v11 }
 0x146   : > { %2137 = vmatmul.mubr.msk.f32.vlgmr.msra.gmra.mrb[0].mxu0 %vm331_vm4, %v296_v14 }
 0x147   : > { %2139 = vmatpush1.msk.msra.mxu0 %vm335_vm2, %v1066_v15  ;;  %1141 = vmatprep.mubr.f32.mxu0 %v2360_v2 }
 0x14e   : > { %2140 = vmatmul.mubr.msk.f32.vlgmr.msra.gmra.mrb[0].mxu0 %vm331_vm4, %v297_v16 }
 0x221   : > { %v1143_v18 = vpop.f32.mrb[0].mxu0 }
 0x222   : > { %v1155_v20 = vadd.f32 %v1153_v17, %v1143_v18  ;;  %v1145_v21 = vpop.f32.mrb[1].mxu0 }
 0x223   : > { %v1156_v22 = vadd.f32 %v1153_v17, %v1145_v21  ;;  %v1172_v17 = vld [vmem:[%s2823_s3 + $0xe] sm:$0x3] }
 0x224   : > { %vm1157_vm15 = vcmp.ge.f32.partialorder %v1155_v20, 0.0  ;;  %v1159_v24 = vmul.f32 0.2, %v1155_v20 }
 0x225   : > { %v1160_v26 = vmul.f32 0.2, %v1156_v22  ;;  %vm1158_vm2 = vcmp.ge.f32.partialorder %v1156_v22, 0.0 }
 0x226   : > { %v1161_v27 = vsel %vm1157_vm15, %v1155_v20, %v1159_v24 }
 0x227   : > { %1177 = vrot.lane.b32.xlu1 %v1161_v27, %s2359_s14  ;;  %1163 = vst [vmem:[%s2628_s12] sm:$0xff] %v1161_v27  ;;  %v1162_v28 = vsel %vm1158_vm2, %v1156_v22, %v1160_v26 }
 0x228   : > { %1164 = vst [vmem:[%s2628_s12 + $0x8] sm:$0xff] %v1162_v28 }
 0x22b   : > { %1179 = vrot.lane.b32.xlu1 %v1162_v28, %s2359_s14  ;;  %s2263_s14 = scalar_lea.vmem %s2002_s9, 256 }
 0x22c   : > { %p2264_p11 = scmp.ne.s32.totalorder %s2002_s9, %s2263_s14 }
 0x22e   : > { %p2265_p12 = pnand %p2264_p11, %p2445_p5 }
 0x230   : > { %p2266_p13 = pneg %p2265_p12 }
 0x299   : > { %v1178_v29 = vpop.permute.xlu1 %1177 }
 0x29a   : > { %v1185_v34 = vsel %vm305_vm0, 0.0, %v1178_v29 }
 0x29d   : > { %v1180_v30 = vpop.permute.xlu1 %1179 }
 0x29e   : > { %v1181_v31 = vsel %vm305_vm0, %v1178_v29, %v1180_v30  ;;  %v1186_v33 = vsel %vm305_vm0, %v1180_v30, 0.0  ;;  %vm1201_vm0 = vcmask 64512  }
 0x29f   : > { %1195 = vrot.lane.b32.xlu1 %v1186_v33, %s2361_s15  ;;  %1193 = vrot.lane.b32.xlu0 %v1181_v31, %s2361_s15 }
 0x2a3   : > { %1352 = vrot.lane.b32.xlu1 %v1181_v31, %s2362_s16  ;;  %1191 = vrot.lane.b32.xlu0 %v1185_v34, %s2361_s15  ;;  %s2370_s15 = smov [#allocation2]  }
 0x2a7   : > { %1350 = vrot.lane.b32.xlu1 %v1185_v34, %s2362_s16  ;;  %1354 = vrot.lane.b32.xlu0 %v1186_v33, %s2362_s16  ;;  %s2267_s16 = sshll.u32 %s2370_s15, 4  ;;  %s2268_s16 = int_to_ptr.vmem [resolvable:$false] %s2267_s16 }
 0x2a8   : > { %p2270_p0 = scmp.lt.s32.totalorder %s2002_s9, %s2268_s16 }
 0x2ab   : > { %1442 = vrot.lane.b32.xlu1 %v1186_v33, %s2363_s17  ;;  %1440 = vrot.lane.b32.xlu0 %v1181_v31, %s2363_s17 }
 0x2af   : > { %1528 = vrot.lane.b32.xlu1 %v1181_v31, %s2364_s18  ;;  %1438 = vrot.lane.b32.xlu0 %v1185_v34, %s2363_s17  ;;  %s2269_s17 = scalar_lea.vmem %s2268_s16, 512 }
 0x2b0   : > { %p2271_p1 = scmp.lt.s32.totalorder %s2269_s17, %s2263_s14 }
 0x2b2   : > { %p2272_p2 = por %p2271_p1, %p2270_p0 }
 0x2b3   : > { %1526 = vrot.lane.b32.xlu1 %v1185_v34, %s2364_s18  ;;  %1530 = vrot.lane.b32.xlu0 %v1186_v33, %s2364_s18 }
 0x2b4   : > { %p2273_p3 = pnand %p2272_p2, %p2266_p13 }
 0x2b7   : > { %1616 = vrot.lane.b32.xlu1 %v1186_v33, %s2365_s19  ;;  %1614 = vrot.lane.b32.xlu0 %v1181_v31, %s2365_s19 }
 0x2bb   : > { %1702 = vrot.lane.b32.xlu1 %v1181_v31, %s2366_s20  ;;  %1612 = vrot.lane.b32.xlu0 %v1185_v34, %s2365_s19 }
 0x2bf   : > { %1700 = vrot.lane.b32.xlu1 %v1185_v34, %s2366_s20  ;;  %1704 = vrot.lane.b32.xlu0 %v1186_v33, %s2366_s20 }
 0x2c3   : > { %1792 = vrot.lane.b32.xlu1 %v1186_v33, %s2367_s26  ;;  %1790 = vrot.lane.b32.xlu0 %v1181_v31, %s2367_s26 }
 0x2c7   : > { %1876 = vrot.lane.b32.xlu1 %v1181_v31, %s2368_s28  ;;  %1788 = vrot.lane.b32.xlu0 %v1185_v34, %s2367_s26  ;;  %s2172_s26 = sshll.u32 %s2428_s25, 8 }
 0x2c8   : > { %s2751_s29 = scalar_lea.hbm %s2825_s5, %s2172_s26 }
 0x2cb   : > { %1874 = vrot.lane.b32.xlu1 %v1185_v34, %s2368_s28  ;;  %1878 = vrot.lane.b32.xlu0 %v1186_v33, %s2368_s28 }
 0x2cf   : > { %1964 = vperm.xlu0 %2261, %v1174_v35  }
 0x311   : > { %v1196_v36 = vpop.permute.xlu1 %1195  ;;  %v1194_v37 = vpop.permute.xlu0 %1193 }
 0x312   : > { %v1198_v38 = vsel %vm328_vm1, %v1194_v37, %v1196_v36 }
 0x313   : > { %1205 = vmatprep.subr.mxu1 %v1198_v38 }
 0x315   : > { %v1353_v39 = vpop.permute.xlu1 %1352  ;;  %v1192_v40 = vpop.permute.xlu0 %1191 }
 0x316   : > { %v1197_v42 = vsel %vm328_vm1, %v1192_v40, %v1194_v37 }
 0x317   : > { %1206 = vmatpush1.msra.mxu1 %v1197_v42 }
 0x318   : > { %2141 = vmatmul.mubr.msk.f32.vlgmr.msra.gmra.mrb[0].mxu1 %vm1201_vm0, %v1166_v41  ;;  %2142 = vmatprep.subr.msk.mxu1 %vm2504_vm3, %v1181_v31 }
 0x319   : > { %v1351_v43 = vpop.permute.xlu1 %1350  ;;  %2143 = vmatpush1.msk.msra.mxu1 %vm2512_vm5, %v1185_v34  ;;  %v1355_v44 = vpop.permute.xlu0 %1354  ;;  %1343 = vmatprep.mubr.f32.mxu1 %v2360_v2 }
 0x31a   : > { %v1357_v45 = vsel %vm503_vm6, %v1353_v39, %v1355_v44  ;;  %v1356_v49 = vsel %vm503_vm6, %v1351_v43, %v1353_v39 }
 0x31b   : > { %2145 = vmatprep.subr.msk.mxu1 %vm2519_vm7, %v1357_v45 }
 0x31d   : > { %v1443_v46 = vpop.permute.xlu1 %1442  ;;  %v1441_v47 = vpop.permute.xlu0 %1440 }
 0x31e   : > { %v1445_v50 = vsel %vm598_vm9, %v1441_v47, %v1443_v46 }
 0x320   : > { %2144 = vmatmul.mubr.msk.f32.vlgmr.msra.gmra.mrb[0].mxu1 %vm1201_vm0, %v1165_v48 }
 0x321   : > { %2146 = vmatpush1.msk.msra.mxu1 %vm2536_vm8, %v1356_v49  ;;  %v1529_v51 = vpop.permute.xlu1 %1528  ;;  %v1439_v52 = vpop.permute.xlu0 %1438  ;;  %1429 = vmatprep.mubr.f32.mxu1 %v2360_v2 }
 0x322   : > { %2148 = vmatprep.subr.msk.mxu1 %vm2504_vm3, %v1445_v50  ;;  %v1444_v56 = vsel %vm598_vm9, %v1439_v52, %v1441_v47 }
 0x325   : > { %v1531_v53 = vpop.permute.xlu0 %1530  ;;  %v1527_v55 = vpop.permute.xlu1 %1526 }
 0x326   : > { %v1533_v57 = vsel %vm693_vm10, %v1529_v51, %v1531_v53  ;;  %v1532_v62 = vsel %vm693_vm10, %v1527_v55, %v1529_v51 }
 0x328   : > { %2147 = vmatmul.mubr.msk.f32.vlgmr.msra.gmra.mrb[0].mxu1 %vm1201_vm0, %v1167_v54 }
 0x329   : > { %2149 = vmatpush1.msk.msra.mxu1 %vm2512_vm5, %v1444_v56  ;;  %v1615_v58 = vpop.permute.xlu0 %1614  ;;  %1517 = vmatprep.mubr.f32.mxu1 %v2360_v2  ;;  %v1617_v59 = vpop.permute.xlu1 %1616 }
 0x32a   : > { %1539 = vmatprep.subr.mxu1 %v1533_v57  ;;  %v1619_v63 = vsel %vm782_vm11, %v1615_v58, %v1617_v59 }
 0x32d   : > { %v1613_v61 = vpop.permute.xlu0 %1612  ;;  %v1703_v0 = vpop.permute.xlu1 %1702 }
 0x32e   : > { %v1618_v4 = vsel %vm782_vm11, %v1613_v61, %v1615_v58 }
 0x330   : > { %2150 = vmatmul.mubr.msk.f32.vlgmr.msra.gmra.mrb[0].mxu1 %vm1201_vm0, %v1168_v60 }
 0x331   : > { %1540 = vmatpush1.msra.mxu1 %v1532_v62  ;;  %1603 = vmatprep.mubr.f32.mxu1 %v2360_v2  ;;  %v1705_v1 = vpop.permute.xlu0 %1704  ;;  %v1701_v5 = vpop.permute.xlu1 %1700 }
 0x332   : > { %2152 = vmatprep.subr.msk.mxu1 %vm2519_vm7, %v1619_v63  ;;  %v1707_v6 = vsel %vm877_vm12, %v1703_v0, %v1705_v1  ;;  %v1706_v10 = vsel %vm877_vm12, %v1701_v5, %v1703_v0 }
 0x335   : > { %v1791_v7 = vpop.permute.xlu0 %1790  ;;  %v1793_v9 = vpop.permute.xlu1 %1792 }
 0x336   : > { %v1795_v12 = vsel %vm972_vm13, %v1791_v7, %v1793_v9 }
 0x338   : > { %2151 = vmatmul.mubr.msk.f32.vlgmr.msra.gmra.mrb[0].mxu1 %vm1201_vm0, %v1169_v3 }
 0x339   : > { %2153 = vmatpush1.msk.msra.mxu1 %vm2536_vm8, %v1618_v4  ;;  %1691 = vmatprep.mubr.f32.mxu1 %v2360_v2  ;;  %v1789_v11 = vpop.permute.xlu0 %1788  ;;  %v1877_v14 = vpop.permute.xlu1 %1876 }
 0x33a   : > { %2155 = vmatprep.subr.msk.mxu1 %vm2504_vm3, %v1707_v6  ;;  %v1794_v15 = vsel %vm972_vm13, %v1789_v11, %v1791_v7 }
 0x33d   : > { %v1879_v13 = vpop.permute.xlu0 %1878  ;;  %v1875_v16 = vpop.permute.xlu1 %1874 }
 0x33e   : > { %v1881_v23 = vsel %vm1061_vm14, %v1877_v14, %v1879_v13  ;;  %v1880_v18 = vsel %vm1061_vm14, %v1875_v16, %v1877_v14 }
 0x340   : > { %2154 = vmatmul.mubr.msk.f32.vlgmr.msra.gmra.mrb[0].mxu1 %vm1201_vm0, %v1170_v8 }
 0x341   : > { %2156 = vmatpush1.msk.msra.mxu1 %vm2512_vm5, %v1706_v10  ;;  %1779 = vmatprep.mubr.f32.mxu1 %v2360_v2 }
 0x342   : > { %1801 = vmatprep.subr.mxu1 %v1795_v12 }
 0x348   : > { %2157 = vmatmul.mubr.msk.f32.vlgmr.msra.gmra.mrb[0].mxu1 %vm1201_vm0, %v1171_v19 }
 0x349   : > { %1802 = vmatpush1.msra.mxu1 %v1794_v15  ;;  %1865 = vmatprep.mubr.f32.mxu1 %v2360_v2 }
 0x34a   : > { %2159 = vmatprep.subr.msk.mxu1 %vm2519_vm7, %v1881_v23 }
 0x350   : > { %2158 = vmatmul.mubr.msk.f32.vlgmr.msra.gmra.mrb[0].mxu1 %vm1201_vm0, %v1172_v17 }
 0x351   : > { %2160 = vmatpush1.msk.msra.mxu1 %vm2536_vm8, %v1880_v18  ;;  %1953 = vmatprep.mubr.f32.mxu1 %v2360_v2 }
 0x358   : > { %2161 = vmatmul.mubr.msk.f32.vlgmr.msra.gmra.mrb[0].mxu1 %vm1201_vm0, %v1173_v25 }
 0x359   : > { %2276 = shalt.err (!%p2273_p3)
}
 0x35a   : > { %s2277_s12 = scalar_lea.hbm %s2751_s29, 256  ;;  %s2281_s20 = scalar_lea.hbm %s2825_s5, 512 }
 0x35b   : > { %p2278_p4 = scmp.ne.s32.totalorder %s2751_s29, %s2277_s12  ;;  %p2282_p9 = scmp.lt.u32.totalorder %s2751_s29, %s2825_s5 }
 0x35c   : > { %p2283_p10 = scmp.lt.u32.totalorder %s2281_s20, %s2277_s12  ;;  %p2285_p12 = scmp.lt.u32.totalorder %s2277_s12, %s2751_s29 }
 0x35d   : > { %p2279_p7 = pnand %p2278_p4, %p2445_p5 }
 0x35e   : > { %p2284_p11 = por %p2283_p10, %p2282_p9 }
 0x35f   : > { %p2280_p8 = pneg %p2279_p7 }
 0x360   : > { %p2286_p13 = por %p2285_p12, %p2284_p11 }
 0x362   : > { %p2287_p0 = pnand %p2286_p13, %p2280_p8 }
 0x364   : > { %2290 = shalt.err (!%p2287_p0)
}
 0x365   : > { %2206 = dma.vmem_to_hbm [thread:$0]  (%p2445_p5), %s2002_s9, 256, %s2751_s29, %s1982_s11   ;;  %v1965_v2 = vpop.permute.xlu0 %1964 }
 0x366   : > { %s2111_s13 = sshll.u32 %s2624_s10, 2  ;;  %s2173_s14 = sshll.u32 %s2428_s25, 6 }
 0x367   : > { %s255_s15 = scalar_lea.vmem [#allocation4], %s2111_s13  ;;  %s2777_s18 = scalar_lea.hbm %s2826_s6, %s2173_s14 }
 0x368   : > { %s2015_s16 = sshll.u32 %s255_s15, 4  ;;  %s1987_s29 = scalar_lea.sflag [#allocation5], %s2624_s10  ;;  %s2779_s16 = int_to_ptr.vmem [resolvable:$true] %s2015_s16 }
 0x369   : > { %s2291_s9 = scalar_lea.vmem %s2779_s16, 64  ;;  %s2371_s25 = smov [#allocation4]  }
 0x36a   : > { %p2292_p1 = scmp.ne.s32.totalorder %s2779_s16, %s2291_s9  ;;  %s2295_s11 = sshll.u32 %s2371_s25, 4  ;;  %s2296_s11 = int_to_ptr.vmem [resolvable:$false] %s2295_s11 }
 0x36b   : > { %s2297_s19 = scalar_lea.vmem %s2296_s11, 128  ;;  %p2298_p4 = scmp.lt.s32.totalorder %s2779_s16, %s2296_s11 }
 0x36c   : > { %p2293_p2 = pnand %p2292_p1, %p2445_p5  ;;  %p2299_p7 = scmp.lt.s32.totalorder %s2297_s19, %s2291_s9 }
 0x36e   : > { %p2294_p3 = pneg %p2293_p2  ;;  %p2300_p8 = por %p2299_p7, %p2298_p4 }
 0x370   : > { %p2301_p9 = pnand %p2300_p8, %p2294_p3 }
 0x42b   : > { %v1955_v32 = vpop.f32.mrb[0].mxu1 }
 0x42c   : > { %v1967_v20 = vadd.f32 %v1965_v2, %v1955_v32  ;;  %v1957_v21 = vpop.f32.mrb[1].mxu1 }
 0x42d   : > { %v1968_v22 = vadd.f32 %v1965_v2, %v1957_v21 }
 0x42f   : > { %v1971_v24 = vcombine.low %v1967_v20, %v1968_v22 }
 0x431   : > { %2162 = vst.sshfl [vmem:[%s255_s15] sm:$0x33 pattern:$0x76325410] %v1971_v24 }
 0x432   : > { %2304 = shalt.err (!%p2301_p9)
}
 0x433   : > { %s2305_s10 = scalar_lea.hbm %s2777_s18, 64  ;;  %s2309_s28 = scalar_lea.hbm %s2826_s6, 128 }
 0x434   : > { %p2306_p10 = scmp.ne.s32.totalorder %s2777_s18, %s2305_s10  ;;  %p2310_p13 = scmp.lt.u32.totalorder %s2777_s18, %s2826_s6 }
 0x435   : > { %p2311_p0 = scmp.lt.u32.totalorder %s2309_s28, %s2305_s10  ;;  %p2313_p2 = scmp.lt.u32.totalorder %s2305_s10, %s2777_s18 }
 0x436   : > { %p2307_p11 = pnand %p2306_p10, %p2445_p5 }
 0x437   : > { %p2312_p1 = por %p2311_p0, %p2310_p13 }
 0x438   : > { %p2308_p12 = pneg %p2307_p11 }
 0x439   : > { %p2314_p3 = por %p2313_p2, %p2312_p1 }
 0x43b   : > { %p2315_p4 = pnand %p2314_p3, %p2308_p12 }
 0x43d   : > { %2318 = shalt.err (!%p2315_p4)
}
 0x43e   : > { %2207 = dma.vmem_to_hbm [thread:$0]  (%p2445_p5), %s2779_s16, 64, %s2777_s18, %s1987_s29  }
 0x43f PF: > { %p2217_p7 = scmp.ge.s32.totalorder %s2357_s24, 2  ;;  %s2027_s15 = sand.u32 1, %s2345_s21  }
 0x440   : > { %s2028_s17 = scalar_lea.sflag [#allocation3], %s2027_s15 }
 0x441   : > { %p2211_p8 = pnand %p2217_p7, %p2449_p6 }
 0x443   : > { %2336 = dma.done.wait (!%p2211_p8), %s2028_s17, 256  }
 0x444   : > { %2338 = vsyncadd (!%p2211_p8), %s2028_s17, 4294967040  ;;  %s2037_s12 = scalar_lea.sflag [#allocation5], %s2027_s15 }
 0x445   : > { %2340 = dma.done.wait (!%p2211_p8), %s2037_s12, 64  }
 0x446   : > { %2342 = vsyncadd (!%p2211_p8), %s2037_s12, 4294967232  ;;  %p20_p5 = scmp.ge.s32.totalorder %s2432_s27, 4   ;;  %s2837_s21 = smov %s2349_s22 }
 0x447   : > { %s2838_s22 = smov %s2353_s23  ;;  %s2839_s23 = smov %s2443_s30 }
 0x448   : > { %s2840_s24 = smov %s2432_s27  ;;  %22 = sbr.rel (!%p20_p5) target bundleno = 5 (0x5), region = 92 }
 0x44f   :  { %2042 = vsyncpa [#allocation3], 1 }
 0x450   :  { %2044 = vsyncpa [#allocation3 + $0x1], 1 }
 0x451   :  { %2045 = vsyncpa [#allocation5], 1 }
 0x452   :  { %2047 = vsyncpa [#allocation5 + $0x1], 1 }

</bundles_post_ra>
